<compile_context>
chip_gen: v7x
topology: tpu7x:2x2x1
jax: 0.10.0
libtpu: 0.0.40
codegen_flags: <defaults>
</compile_context>

<pallas_src>
import functools

import jax
import jax.numpy as jnp
from jax import lax
from jax.experimental import pallas as pl
from jax.experimental.pallas import tpu as pltpu


# ----------------------------------------------------------------------------
# kernel_size < 0 path:  squeeze -> cat(dim=1) -> Linear(bias) -> Linear(bias)
# ----------------------------------------------------------------------------
def _linear_kernel(ts_ref, ev_ref, w1_ref, b1_ref, w2_ref, b2_ref, o_ref):
    # ts:(TB,n_ts) ev:(TB,n_ev)  w1:(n_ts+n_ev,H) b1:(1,H)  w2:(H,Opad) b2:(1,Opad)
    # In-kernel lane concat (never touches HBM) -> one K=120 MXU pass instead of
    # two padded K=60 passes.
    x = jnp.concatenate([ts_ref[...], ev_ref[...]], axis=1)
    h = jnp.dot(x, w1_ref[...], preferred_element_type=jnp.float32) + b1_ref[...]
    if x.dtype != jnp.float32:
        # bf16 model: round the f32-accumulated hidden layer before the 2nd MXU
        # pass (intentional; halves MXU work). f32 model keeps full precision.
        h = h.astype(x.dtype)
    y = jnp.dot(h, w2_ref[...], preferred_element_type=jnp.float32) + b2_ref[...]
    o_ref[...] = y.astype(o_ref.dtype)


def _squeeze_like_torch(x):
    # torch: x.squeeze() drops ALL size-1 dims; then unsqueeze(0) if ndim < 2.
    x = jnp.squeeze(x)
    if x.ndim < 2:
        x = x[None, :]
    return x


def pack_linear_params(w1_t, b1, w2_t, b2, *, lane_multiple=128):
    """One-time repack (call at parameter-load time, NOT per forward).
    w1_t: (in_features, hidden) = torch weight.T ; w2_t: (hidden, out) = torch.T.
    Pads the output-feature dim with zero columns up to a multiple of 128 so the
    kernel's final store is unmasked / lane-dense; the wrapper slices back."""
    _, out_features = w2_t.shape
    o_pad = int(pl.cdiv(out_features, lane_multiple)) * lane_multiple
    return dict(
        w1=w1_t,
        b1=b1.reshape(1, -1),
        w2=jnp.pad(w2_t, ((0, 0), (0, o_pad - out_features))),
        b2=jnp.pad(b2, (0, o_pad - out_features)).reshape(1, -1),
        out_features=out_features,
    )


def aggre_output_linear(ts_predict, event_predict, lin_params, *, batch_tile=8,
                        vmem_limit_bytes=32 << 20):
    """kernel_size < 0 path.  lin_params from pack_linear_params."""
    ts = _squeeze_like_torch(ts_predict)
    ev = _squeeze_like_torch(event_predict)
    dtype = jnp.promote_types(ts.dtype, ev.dtype)   # keep out_shape / promotion consistent
    ts = ts.astype(dtype)
    ev = ev.astype(dtype)
    B, n_ts = ts.shape
    n_ev = ev.shape[1]
    out_features = lin_params["out_features"]
    hidden = lin_params["w1"].shape[1]
    o_pad = lin_params["w2"].shape[1]

    tb = min(batch_tile, B)                   # rows per grid step (multiple of 8 when B>=8)
    n_tiles = pl.cdiv(B, tb)
    b_pad = n_tiles * tb
    if b_pad != B:
        ts = jnp.pad(ts, ((0, b_pad - B), (0, 0)))
        ev = jnp.pad(ev, ((0, b_pad - B), (0, 0)))

    out = pl.pallas_call(
        _linear_kernel,
        out_shape=jax.ShapeDtypeStruct((b_pad, o_pad), dtype),
        grid=(n_tiles,),
        in_specs=[
            pl.BlockSpec((tb, n_ts), lambda i: (i, 0)),
            pl.BlockSpec((tb, n_ev), lambda i: (i, 0)),
            # Grid-invariant weights / biases (resident in VMEM).
            pl.BlockSpec((n_ts + n_ev, hidden), lambda i: (0, 0)),
            pl.BlockSpec((1, hidden), lambda i: (0, 0)),
            pl.BlockSpec((hidden, o_pad), lambda i: (0, 0)),
            pl.BlockSpec((1, o_pad), lambda i: (0, 0)),
        ],
        out_specs=pl.BlockSpec((tb, o_pad), lambda i: (i, 0)),
        compiler_params=pltpu.CompilerParams(
            dimension_semantics=("parallel",),          # B-tiles -> 2 TCs on v7x
            vmem_limit_bytes=vmem_limit_bytes),
    )(ts, ev, lin_params["w1"], lin_params["b1"], lin_params["w2"], lin_params["b2"])
    return out[:B, :out_features]


# ----------------------------------------------------------------------------
# kernel_size > 0 path:  causal pad -> Conv1d(bias) -> "same" Conv1d(no bias)
# ----------------------------------------------------------------------------
def _shift_within_blocks(x, d, block_len):
    """x: (C, N) with N = TB*block_len, columns batch-major / time-minor.
    Returns y with y[:, n] = x[:, n + d] when n+d stays inside the same
    length-`block_len` batch block, else 0.  d is a static Python int.
    Uses pltpu.roll (XLU slot) + an iota mask instead of zero-concat + slices."""
    if d == 0:
        return x
    n_total = x.shape[1]
    y = pltpu.roll(x, shift=(-d) % n_total, axis=1)
    pos = lax.broadcasted_iota(jnp.int32, x.shape, 1) % block_len
    valid = jnp.logical_and(pos + d >= 0, pos + d < block_len)
    return jnp.where(valid, y, jnp.zeros_like(y))


def _im2col_taps(x, ksize, disp0, block_len):
    """(C, TB*L) -> (ksize*C, TB*L); rows tap-major (tap j uses displacement
    disp0 + j), matching the tap-major weight repack in pack_conv_params."""
    return jnp.concatenate(
        [_shift_within_blocks(x, disp0 + j, block_len) for j in range(ksize)], axis=0)


def _fused_conv_kernel(ts_ref, ev_ref, w1ts_ref, w1ev_ref, b1_ref, w2_ref, o_ref,
                       *, ksize, block_len):
    f32 = jnp.float32
    disp1 = -(ksize - 1)               # layer 1: causal, left pad K-1
    disp2 = -((ksize - 1) // 2)        # layer 2: "same", pad (K-1)//2 both sides
    # ---- layer 1: Conv1d(cat([ts, ev]), bias=True) ---------------------------
    # ts/ev stay separate operands; W1 is pre-split per channel block, so no
    # channel concat is needed: conv(cat) == W1_ts @ ts_cols + W1_ev @ ev_cols.
    xc_ts = _im2col_taps(ts_ref[...], ksize, disp1, block_len)   # (K*c_ts, TB*L)
    xc_ev = _im2col_taps(ev_ref[...], ksize, disp1, block_len)   # (K*c_ev, TB*L)
    h = (jnp.dot(w1ts_ref[...], xc_ts, preferred_element_type=f32)
         + jnp.dot(w1ev_ref[...], xc_ev, preferred_element_type=f32)
         + b1_ref[...])                                          # (H, TB*L) f32
    if ts_ref.dtype != jnp.float32:
        h = h.astype(ts_ref.dtype)     # bf16 model: keep MXU operands bf16
    # ---- layer 2: "same"-padded Conv1d, bias=False ---------------------------
    # Hidden activation never leaves VMEM (no HBM round-trip).
    hc = _im2col_taps(h, ksize, disp2, block_len)                # (K*H, TB*L)
    y = jnp.dot(w2_ref[...], hc, preferred_element_type=f32)     # (cout, TB*L)
    o_ref[...] = y.astype(o_ref.dtype)                           # lane-dense store


def pack_conv_params(w1, b1, w2, c_ts):
    """One-time repack (call at parameter-load time, NOT per forward).
    w1: (hidden, c_ts+c_ev, K), w2: (out, hidden, K) in PyTorch Conv1d layout."""
    hidden, cin, ksize = w1.shape
    cout = w2.shape[0]
    w1c = jnp.transpose(w1, (0, 2, 1))                       # (H, K, Cin) tap-major
    return dict(
        w1_ts=w1c[:, :, :c_ts].reshape(hidden, ksize * c_ts),
        w1_ev=w1c[:, :, c_ts:].reshape(hidden, ksize * (cin - c_ts)),
        b1=b1.reshape(hidden, 1),
        w2=jnp.transpose(w2, (0, 2, 1)).reshape(cout, ksize * hidden),
        hidden=hidden, cout=cout, ksize=ksize,
    )


def aggre_output_conv(ts_predict, event_predict, conv_params, *, batch_tile=8,
                      vmem_limit_bytes=32 << 20):
    """kernel_size > 0 path.  ts (B, c_ts, L), ev (B, c_ev, L) in NCL layout
    (as torch Conv1d expects).  conv_params from pack_conv_params."""
    ksize = conv_params["ksize"]
    hidden = conv_params["hidden"]
    cout = conv_params["cout"]
    B, c_ts, L = ts_predict.shape
    c_ev = event_predict.shape[1]
    assert ksize <= L, "kernel_size larger than sequence length is unsupported"
    pad2 = (ksize - 1) // 2
    l2 = L + 2 * pad2 - ksize + 1          # == L for odd K, L-1 for even K (torch)

    dtype = jnp.promote_types(ts_predict.dtype, event_predict.dtype)
    ts_predict = ts_predict.astype(dtype)
    event_predict = event_predict.astype(dtype)

    # Batch tile: pack TB batch elems into the lane dim of every matmul so
    # N = TB*L (>=128) instead of N = L, and every store is lane-dense.
    tb = min(batch_tile, B)
    if B > tb and (tb * L) % 128 != 0:
        tb = B                              # fall back to one full-batch tile
    n_tiles = pl.cdiv(B, tb)
    b_pad = n_tiles * tb

    # NCL -> (C, B*L) once in the wrapper (tiny XLA transpose); kernel then works
    # on lane-dense 2-D slabs end to end, columns batch-major / time-minor.
    def to_c_bl(x, c):
        x = jnp.transpose(x, (1, 0, 2))                       # (C, B, L)
        if b_pad != B:
            x = jnp.pad(x, ((0, 0), (0, b_pad - B), (0, 0)))
        return x.reshape(c, b_pad * L)

    ts2d = to_c_bl(ts_predict, c_ts)
    ev2d = to_c_bl(event_predict, c_ev)

    kern = functools.partial(_fused_conv_kernel, ksize=ksize, block_len=L)
    out2d = pl.pallas_call(
        kern,
        out_shape=jax.ShapeDtypeStruct((cout, b_pad * L), dtype),
        grid=(n_tiles,),
        in_specs=[
            pl.BlockSpec((c_ts, tb * L), lambda i: (0, i)),
            pl.BlockSpec((c_ev, tb * L), lambda i: (0, i)),
            # Grid-invariant weights / bias, resident in VMEM.
            # TODO(synk): single-buffer these via pipeline_mode=pl.Buffered(1) on
            # JAX versions that accept buffer_count=1 (halves their VMEM on v7x).
            pl.BlockSpec((hidden, ksize * c_ts), lambda i: (0, 0)),
            pl.BlockSpec((hidden, ksize * c_ev), lambda i: (0, 0)),
            pl.BlockSpec((hidden, 1), lambda i: (0, 0)),
            pl.BlockSpec((cout, ksize * hidden), lambda i: (0, 0)),
        ],
        out_specs=pl.BlockSpec((cout, tb * L), lambda i: (0, i)),
        compiler_params=pltpu.CompilerParams(
            dimension_semantics=("parallel",),      # batch tiles -> 2 TCs on v7x
            vmem_limit_bytes=vmem_limit_bytes),
    )(ts2d, ev2d, conv_params["w1_ts"], conv_params["w1_ev"],
      conv_params["b1"], conv_params["w2"])

    # Lane-dense (cout, B_pad*L) slab -> (B, cout, l2).
    out = jnp.transpose(out2d.reshape(cout, b_pad, L), (1, 0, 2))
    return out[:B, :, :l2]


# ------------------------------ references -----------------------------------
def _ref_linear(ts, ev, w1, b1, w2, b2):
    x = jnp.concatenate([_squeeze_like_torch(ts), _squeeze_like_torch(ev)], axis=1)
    h = jnp.dot(x, w1, precision=lax.Precision.HIGHEST) + b1
    return jnp.dot(h, w2, precision=lax.Precision.HIGHEST) + b2


def _ref_conv1d(x_ncl, w_oik, b, pad_left, pad_right):
    K = w_oik.shape[2]
    xpad = jnp.pad(x_ncl, ((0, 0), (0, 0), (pad_left, pad_right)))
    L = xpad.shape[2] - K + 1
    y = sum(jnp.einsum('oc,bcl->bol', w_oik[:, :, k], xpad[:, :, k:k + L],
                       precision=lax.Precision.HIGHEST)
            for k in range(K))
    if b is not None:
        y = y + b[None, :, None]
    return y


def _ref_conv(ts, ev, w1, b1, w2, K):
    x = jnp.concatenate([ts, ev], axis=1)
    h = _ref_conv1d(x, w1, b1, K - 1, 0)
    return _ref_conv1d(h, w2, None, (K - 1) // 2, (K - 1) // 2)


if __name__ == "__main__":
    key = jax.random.PRNGKey(0)
    ks = jax.random.split(key, 12)

    # ---- default path (kernel_size = -1): Linear -> Linear -------------------
    # Module defaults: in_features = 120 (ts 60 + ev 60), hidden = 256, out = 60.
    # B = 16 -> two 8-row tiles (even grid length: balances v7x's 2 TensorCores).
    B, n_ts, n_ev, hidden, out_features = 16, 60, 60, 256, 60
    ts = jax.random.normal(ks[0], (B, n_ts, 1), jnp.float32)   # squeezed in fwd
    ev = jax.random.normal(ks[1], (B, n_ev, 1), jnp.float32)
    w1 = 0.05 * jax.random.normal(ks[2], (n_ts + n_ev, hidden), jnp.float32)
    b1 = 0.05 * jax.random.normal(ks[3], (hidden,), jnp.float32)
    w2 = 0.05 * jax.random.normal(ks[4], (hidden, out_features), jnp.float32)
    b2 = 0.05 * jax.random.normal(ks[5], (out_features,), jnp.float32)

    lin_params = pack_linear_params(w1, b1, w2, b2)            # once, at load time
    out_lin = jax.block_until_ready(aggre_output_linear(ts, ev, lin_params))
    ref_lin = _ref_linear(ts, ev, w1, b1, w2, b2)
    assert out_lin.shape == (B, out_features)
    assert jnp.allclose(out_lin, ref_lin, atol=2e-3, rtol=2e-3), \
        float(jnp.max(jnp.abs(out_lin - ref_lin)))

    # ---- conv path (kernel_size = 3): causal pad -> Conv1d -> Conv1d ---------
    # TB = 8, L = 16 -> matmul/store lane width TB*L = 128 (unmasked, MXU-full);
    # grid = (2,) batch tiles.
    K, L, c_ts, c_ev, hidden_c, out_c = 3, 16, 8, 8, 16, 8
    cin = c_ts + c_ev
    ts_c = jax.random.normal(ks[6], (B, c_ts, L), jnp.float32)
    ev_c = jax.random.normal(ks[7], (B, c_ev, L), jnp.float32)
    cw1 = 0.1 * jax.random.normal(ks[8], (hidden_c, cin, K), jnp.float32)   # torch OIK
    cb1 = 0.1 * jax.random.normal(ks[9], (hidden_c,), jnp.float32)
    cw2 = 0.1 * jax.random.normal(ks[10], (out_c, hidden_c, K), jnp.float32)

    conv_params = pack_conv_params(cw1, cb1, cw2, c_ts)        # once, at load time
    out_conv = jax.block_until_ready(
        aggre_output_conv(ts_c, ev_c, conv_params, batch_tile=8))
    ref_conv = _ref_conv(ts_c, ev_c, cw1, cb1, cw2, K)
    l2 = L + 2 * ((K - 1) // 2) - K + 1
    assert out_conv.shape == (B, out_c, l2)
    assert jnp.allclose(out_conv, ref_conv, atol=1e-3, rtol=1e-3), \
        float(jnp.max(jnp.abs(out_conv - ref_conv)))

    print("KERNEL_OK")
</pallas_src>

<mosaic_0001>
module attributes {stable_mosaic.version = 11 : i64} {
  func.func @_linear_kernel(%arg0: i32, %arg1: memref<8x60xf32, #tpu.memory_space<vmem>>, %arg2: memref<8x60xf32, #tpu.memory_space<vmem>>, %arg3: memref<120x256xf32, #tpu.memory_space<vmem>>, %arg4: memref<1x256xf32, #tpu.memory_space<vmem>>, %arg5: memref<256x128xf32, #tpu.memory_space<vmem>>, %arg6: memref<1x128xf32, #tpu.memory_space<vmem>>, %arg7: memref<8x128xf32, #tpu.memory_space<vmem>>) attributes {dimension_semantics = [#tpu.dimension_semantics<parallel>], iteration_bounds = array<i64: 2>, scalar_prefetch = 0 : i64, scratch_operands = 0 : i64, tpu.core_type = #tpu.core_type<tc>, window_params = [{transform_indices = @transform_0, window_bounds = array<i64: 8, 60>}, {transform_indices = @transform_1, window_bounds = array<i64: 8, 60>}, {pipeline_mode = #tpu.pipeline_mode<synchronous>, transform_indices = @transform_2, window_bounds = array<i64: 120, 256>}, {pipeline_mode = #tpu.pipeline_mode<synchronous>, transform_indices = @transform_3, window_bounds = array<i64: 1, 256>}, {pipeline_mode = #tpu.pipeline_mode<synchronous>, transform_indices = @transform_4, window_bounds = array<i64: 256, 128>}, {pipeline_mode = #tpu.pipeline_mode<synchronous>, transform_indices = @transform_5, window_bounds = array<i64: 1, 128>}, {transform_indices = @transform_6, window_bounds = array<i64: 8, 128>}]} {
    %c0 = arith.constant 0 : index
    %c0_0 = arith.constant 0 : index
    %0 = vector.load %arg1[%c0, %c0_0] : memref<8x60xf32, #tpu.memory_space<vmem>>, vector<8x60xf32>
    %c0_1 = arith.constant 0 : index
    %c0_2 = arith.constant 0 : index
    %1 = vector.load %arg2[%c0_1, %c0_2] : memref<8x60xf32, #tpu.memory_space<vmem>>, vector<8x60xf32>
    %2 = tpu.concatenate %0, %1 in 1 : vector<8x60xf32>, vector<8x60xf32> -> vector<8x120xf32>
    %c0_3 = arith.constant 0 : index
    %c0_4 = arith.constant 0 : index
    %3 = vector.load %arg3[%c0_3, %c0_4] : memref<120x256xf32, #tpu.memory_space<vmem>>, vector<120x256xf32>
    %cst = arith.constant dense<0.000000e+00> : vector<8x256xf32>
    %4 = tpu.matmul %2, %3, %cst {dimension_numbers = #tpu.dot_dimension_numbers<[1], [0], [0], [1], [0, 0, 1, 1], [], []>} : vector<8x120xf32>, vector<120x256xf32>, vector<8x256xf32> -> vector<8x256xf32>
    %c0_5 = arith.constant 0 : index
    %c0_6 = arith.constant 0 : index
    %5 = vector.load %arg4[%c0_5, %c0_6] : memref<1x256xf32, #tpu.memory_space<vmem>>, vector<1x256xf32>
    %6 = vector.broadcast %5 : vector<1x256xf32> to vector<8x256xf32>
    %7 = arith.addf %4, %6 : vector<8x256xf32>
    %c0_7 = arith.constant 0 : index
    %c0_8 = arith.constant 0 : index
    %8 = vector.load %arg5[%c0_7, %c0_8] : memref<256x128xf32, #tpu.memory_space<vmem>>, vector<256x128xf32>
    %cst_9 = arith.constant dense<0.000000e+00> : vector<8x128xf32>
    %9 = tpu.matmul %7, %8, %cst_9 {dimension_numbers = #tpu.dot_dimension_numbers<[1], [0], [0], [1], [0, 0, 1, 1], [], []>} : vector<8x256xf32>, vector<256x128xf32>, vector<8x128xf32> -> vector<8x128xf32>
    %c0_10 = arith.constant 0 : index
    %c0_11 = arith.constant 0 : index
    %10 = vector.load %arg6[%c0_10, %c0_11] : memref<1x128xf32, #tpu.memory_space<vmem>>, vector<1x128xf32>
    %11 = vector.broadcast %10 : vector<1x128xf32> to vector<8x128xf32>
    %12 = arith.addf %9, %11 : vector<8x128xf32>
    %c0_12 = arith.constant 0 : index
    %c0_13 = arith.constant 0 : index
    %13 = vector.load %arg7[%c0_12, %c0_13] : memref<8x128xf32, #tpu.memory_space<vmem>>, vector<8x128xf32>
    tpu.vector_store %arg7[%c0_12, %c0_13], %12 {strides = array<i32>} : memref<8x128xf32, #tpu.memory_space<vmem>>, vector<8x128xf32>,
    return
  }
  func.func @transform_0(%arg0: i32) -> (i32, i32) {
    %c0_i32 = arith.constant 0 : i32
    %c0_i32_0 = arith.constant 0 : i32
    return %arg0, %c0_i32 : i32, i32
  }
  func.func @transform_1(%arg0: i32) -> (i32, i32) {
    %c0_i32 = arith.constant 0 : i32
    %c0_i32_0 = arith.constant 0 : i32
    return %arg0, %c0_i32 : i32, i32
  }
  func.func @transform_2(%arg0: i32) -> (i32, i32) {
    %c0_i32 = arith.constant 0 : i32
    %c0_i32_0 = arith.constant 0 : i32
    %c0_i32_1 = arith.constant 0 : i32
    return %c0_i32, %c0_i32_0 : i32, i32
  }
  func.func @transform_3(%arg0: i32) -> (i32, i32) {
    %c0_i32 = arith.constant 0 : i32
    %c0_i32_0 = arith.constant 0 : i32
    %c0_i32_1 = arith.constant 0 : i32
    return %c0_i32, %c0_i32_0 : i32, i32
  }
  func.func @transform_4(%arg0: i32) -> (i32, i32) {
    %c0_i32 = arith.constant 0 : i32
    %c0_i32_0 = arith.constant 0 : i32
    %c0_i32_1 = arith.constant 0 : i32
    return %c0_i32, %c0_i32_0 : i32, i32
  }
  func.func @transform_5(%arg0: i32) -> (i32, i32) {
    %c0_i32 = arith.constant 0 : i32
    %c0_i32_0 = arith.constant 0 : i32
    %c0_i32_1 = arith.constant 0 : i32
    return %c0_i32, %c0_i32_0 : i32, i32
  }
  func.func @transform_6(%arg0: i32) -> (i32, i32) {
    %c0_i32 = arith.constant 0 : i32
    %c0_i32_0 = arith.constant 0 : i32
    return %arg0, %c0_i32 : i32, i32
  }
}

</mosaic_0001>

<bundles_post_ra>
// kernel: tpu_custom_call.1
= control target key start
LH: loop header
LB: loop body
LE: loop exit
PB: predicated region body
PF: predicated region fallthrough
CT: control target
= control target key end

     0   :  { %s1412_s0 = inlined_call_operand.hbm [shape: f32[16,60], index: 0, kind: input, shape index: {}]   ;;  %s1413_s1 = inlined_call_operand.hbm [shape: f32[16,60], index: 1, kind: input, shape index: {}]   ;;  %s1414_s2 = inlined_call_operand.hbm [shape: f32[120,256], index: 2, kind: input, shape index: {}]   ;;  %s1415_s3 = inlined_call_operand.vmem [shape: f32[1,256], index: 3, kind: input, shape index: {}]   ;;  %s1416_s4 = inlined_call_operand.hbm [shape: f32[256,128], index: 4, kind: input, shape index: {}]   ;;  %s1417_s5 = inlined_call_operand.vmem [shape: f32[1,128], index: 5, kind: input, shape index: {}]   ;;  %s1418_s6 = inlined_call_operand.hbm [shape: f32[16,128], index: 6, kind: output, shape index: {}]  }
   0x1   :  { %1423 = sst [smem:[#allocation17_spill]] %s1414_s2 }
   0x2   :  { %1424 = sst [smem:[#allocation18_spill]] %s1416_s4 }
   0x3   :  { %11 = vsyncpa [#allocation3], 0 }
   0x4   :  { %13 = vsyncpa [#allocation3 + $0x1], 0 }
   0x5   :  { %14 = vsyncpa [#allocation6], 0 }
   0x6   :  { %16 = vsyncpa [#allocation6 + $0x1], 0 }
   0x7   :  { %17 = vsyncpa [#allocation9], 0 }
   0x8   :  { %18 = vsyncpa [#allocation4], 0 }
   0x9   :  { %20 = vsyncpa [#allocation4 + $0x1], 0  ;;  %s1130_s21 = smov 0   ;;  %s1132_s22 = smov 0  }
   0xa   :  { %s1134_s23 = smov 0   ;;  %s1136_s24 = smov 0  }
   0xb LB: > { %s1151_s25 = sadd.s32 4294967295, %s1082_s24   ;;  %s694_s26 = sadd.s32 4294967294, %s1082_s24   ;;  %s1082_s24 = sphi %s1136_s24, %s1448_s24   ;;  %s1078_s23 = sphi %s1134_s23, %s1447_s23   ;;  %s1074_s22 = sphi %s1132_s22, %s1446_s22   ;;  %s1070_s21 = sphi %s1130_s21, %s1445_s21  }
   0xc   : > { %p46_p0 = scmp.ne.s32.totalorder %s1074_s22, %s1070_s21  ;;  %p1419_p1 = scmp.eq.s32.totalorder %s1151_s25, 0 }
   0xd   : > { %p186_p3 = scmp.eq.s32.totalorder %s694_s26, 1  ;;  %p695_p5 = scmp.ge.s32.totalorder %s1082_s24, 1 }
   0xe   : > { %p1160_p4 = por %p1419_p1, %p46_p0  ;;  %p193_p7 = scmp.lt.s32.totalorder %s1082_s24, 3 }
   0xf   : > { %p1165_p6 = por %p186_p3, %p46_p0  ;;  %s1084_s30 = smov [#allocation7]  }
  0x10   : > { %s1425_s27 = scalar_select %p1160_p4, 1, 0 }
  0x11   : > { %s1426_s28 = scalar_select %p1165_p6, 1, 0 }
  0x12   : > { %p1170_p8 = pnand %p695_p5, %p193_p7  ;;  %s205_s7 = sshll.u32 %s1084_s30, 4  ;;  %s1174_s7 = int_to_ptr.vmem [resolvable:$true] %s205_s7 }
  0x13   : > { %s1085_s9 = smov [#allocation8]   ;;  %s1429_s2 = sld [smem:[#allocation17_spill]] }
  0x14   : > { %s1427_s29 = scalar_select %p1170_p8, 1, 0 }
  0x15   : > { %p824_p9 = pneg %p1170_p8  ;;  %s221_s10 = sshll.u32 %s1085_s9, 4  ;;  %s1185_s10 = int_to_ptr.vmem [resolvable:$true] %s221_s10 }
  0x17   : > { %p1181_p11 = pnand %p824_p9, %p1419_p1 }
  0x19   : > { %s888_s13 = scalar_lea.hbm %s1429_s2, 3840  ;;  %p890_p13 = pneg %p1181_p11 }
  0x1a   : > { %p889_p12 = scmp.ne.s32.totalorder %s1429_s2, %s888_s13  ;;  %p895_p5 = scmp.lt.u32.totalorder %s888_s13, %s1429_s2 }
  0x1c   : > { %p891_p0 = pnand %p890_p13, %p889_p12 }
  0x1e   : > { %p892_p3 = pneg %p891_p0 }
  0x20   : > { %p897_p7 = pnand %p895_p5, %p892_p3 }
  0x22   : > { %900 = shalt.err (!%p897_p7)
}
  0x23   : > { %s901_s18 = scalar_lea.vmem %s1174_s7, 3840  ;;  %p909_p2 = scmp.lt.s32.totalorder %s1174_s7, %s1174_s7 }
  0x24   : > { %p902_p9 = scmp.ne.s32.totalorder %s1174_s7, %s901_s18  ;;  %p910_p12 = scmp.lt.s32.totalorder %s901_s18, %s901_s18 }
  0x26   : > { %p904_p10 = pnand %p902_p9, %p890_p13  ;;  %p911_p0 = por %p910_p12, %p909_p2 }
  0x28   : > { %p905_p1 = pneg %p904_p10 }
  0x2a   : > { %p912_p6 = pnand %p911_p0, %p905_p1 }
  0x2c   : > { %915 = shalt.err (!%p912_p6)
}
  0x2d   : > { %s1086_s19 = smov 256   ;;  %s1087_s20 = smov 16  }
  0x2e   : > { %827 = dma.hbm_to_vmem [thread:$0]  (!%p1181_p11), %s1429_s2, 3840, %s1174_s7, [#allocation6], %s1086_s19, %s1086_s19, %s1087_s20  }
  0x2f   : > { %s1430_s4 = sld [smem:[#allocation18_spill]] }
  0x35   : > { %s916_s12 = scalar_lea.hbm %s1430_s4, 4096 }
  0x36   : > { %p917_p2 = scmp.ne.s32.totalorder %s1430_s4, %s916_s12  ;;  %p923_p10 = scmp.lt.u32.totalorder %s916_s12, %s1430_s4 }
  0x38   : > { %p919_p1 = pnand %p917_p2, %p890_p13 }
  0x3a   : > { %p920_p6 = pneg %p919_p1 }
  0x3c   : > { %p925_p3 = pnand %p923_p10, %p920_p6 }
  0x3e   : > { %928 = shalt.err (!%p925_p3)
}
  0x3f   : > { %s929_s7 = scalar_lea.vmem %s1185_s10, 4096  ;;  %p937_p12 = scmp.lt.s32.totalorder %s1185_s10, %s1185_s10 }
  0x40   : > { %p930_p5 = scmp.ne.s32.totalorder %s1185_s10, %s929_s7  ;;  %p938_p0 = scmp.lt.s32.totalorder %s929_s7, %s929_s7 }
  0x42   : > { %p932_p7 = pnand %p930_p5, %p890_p13  ;;  %p939_p2 = por %p938_p0, %p937_p12 }
  0x44   : > { %p933_p9 = pneg %p932_p7 }
  0x46   : > { %p940_p1 = pnand %p939_p2, %p933_p9 }
  0x48   : > { %943 = shalt.err (!%p940_p1)
}
  0x49   : > { %s1088_s17 = smov 128   ;;  %s1089_s18 = smov 8  }
  0x4a   : > { %830 = dma.hbm_to_vmem [thread:$0]  (!%p1181_p11), %s1430_s4, 4096, %s1185_s10, [#allocation9], %s1088_s17, %s1088_s17, %s1089_s18  }
  0x4b   : > { %s1240_s26 = sadd.s32 1, %s1082_s24   ;;  %s33_s9 = sadd.s32 1, %s1078_s23 }
  0x4c   : > { %s30_s30 = ssub.s32 %s1082_s24, %s1240_s26  ;;  %p40_p6 = scmp.ne.s32.totalorder %s1078_s23, %s1074_s22 }
  0x4d   : > { %p31_p13 = scmp.eq.s32.totalorder %s30_s30, 0  ;;  %p41_p10 = scmp.eq.s32.totalorder %s1082_s24, 0 }
  0x4e   : > { %p1432_p5 = scmp.eq.s32.totalorder %s1151_s25, 1  ;;  %p844_p9 = scmp.lt.s32.totalorder %s1082_s24, 2 }
  0x4f   : > { %s1249_s11 = scalar_select %p31_p13, %s1078_s23, %s33_s9  }
  0x50   : > { %p42_p3 = por %p41_p10, %p40_p6  ;;  %p1253_p7 = por %p1432_p5, %p40_p6 }
  0x51   : > { %1431 = sst [smem:[#allocation16_spill]] %s1249_s11  ;;  %s238_s8 = sand.u32 1, %s1078_s23  }
  0x52   : > { %s1433_s12 = scalar_select %p1253_p7, 1, 0 }
  0x53   : > { %s1259_s10 = sshll.u32 %s238_s8, 3  ;;  %s700_s13 = sshll.u32 %s1082_s24, 7 }
  0x54   : > { %s1265_s16 = scalar_lea.hbm %s1412_s0, %s700_s13  ;;  %s242_s7 = scalar_lea.vmem [#allocation2], %s1259_s10 }
  0x55   : > { %s249_s17 = sshll.u32 %s242_s7, 4  ;;  %p1270_p11 = pnand %p844_p9, %p42_p3  ;;  %s1268_s17 = int_to_ptr.vmem [resolvable:$true] %s249_s17 }
  0x56   : > { %s1277_s30 = scalar_lea.hbm %s1413_s1, %s700_s13  ;;  %s256_s9 = sand.u32 1, %s1082_s24  }
  0x57   : > { %s239_s14 = scalar_lea.sflag [#allocation3], %s238_s8  ;;  %s944_s15 = scalar_lea.hbm %s1265_s16, 128 }
  0x58   : > { %p945_p12 = scmp.ne.s32.totalorder %s1265_s16, %s944_s15  ;;  %p946_p0 = pneg %p1270_p11 }
  0x59   : > { %s949_s4 = scalar_lea.hbm %s1412_s0, 256  ;;  %p950_p13 = scmp.lt.u32.totalorder %s1265_s16, %s1412_s0 }
  0x5a   : > { %p947_p2 = pnand %p946_p0, %p945_p12  ;;  %p951_p6 = scmp.lt.u32.totalorder %s949_s4, %s944_s15 }
  0x5b   : > { %p953_p3 = scmp.lt.u32.totalorder %s944_s15, %s1265_s16 }
  0x5c   : > { %p948_p1 = pneg %p947_p2  ;;  %p952_p10 = por %p951_p6, %p950_p13 }
  0x5e   : > { %p954_p5 = por %p953_p3, %p952_p10 }
  0x60   : > { %p955_p9 = pnand %p954_p5, %p948_p1 }
  0x62   : > { %958 = shalt.err (!%p955_p9)
}
  0x63   : > { %s959_s8 = scalar_lea.vmem %s1268_s17, 128  ;;  %s1090_s2 = smov [#allocation2]  }
  0x64   : > { %p960_p12 = scmp.ne.s32.totalorder %s1268_s17, %s959_s8  ;;  %s964_s13 = sshll.u32 %s1090_s2, 4  ;;  %s965_s13 = int_to_ptr.vmem [resolvable:$false] %s964_s13 }
  0x65   : > { %s966_s11 = scalar_lea.vmem %s965_s13, 256  ;;  %p967_p4 = scmp.lt.s32.totalorder %s1268_s17, %s965_s13 }
  0x66   : > { %p962_p2 = pnand %p960_p12, %p946_p0  ;;  %p968_p13 = scmp.lt.s32.totalorder %s966_s11, %s959_s8 }
  0x68   : > { %p963_p7 = pneg %p962_p2  ;;  %p969_p6 = por %p968_p13, %p967_p4 }
  0x6a   : > { %p970_p10 = pnand %p969_p6, %p963_p7 }
  0x6c   : > { %973 = shalt.err (!%p970_p10)
}
  0x6d   : > { %834 = dma.hbm_to_vmem [thread:$0]  (!%p1270_p11), %s1265_s16, 128, %s1268_s17, %s239_s14  }
  0x6e   : > { %s260_s4 = scalar_lea.vmem [#allocation5], %s1259_s10  ;;  %s257_s15 = scalar_lea.sflag [#allocation6], %s256_s9 }
  0x6f   : > { %s267_s20 = sshll.u32 %s260_s4, 4  ;;  %s974_s7 = scalar_lea.hbm %s1277_s30, 128  ;;  %s268_s20 = int_to_ptr.vmem [resolvable:$true] %s267_s20 }
  0x70   : > { %p975_p4 = scmp.ne.s32.totalorder %s1277_s30, %s974_s7  ;;  %s979_s2 = scalar_lea.hbm %s1413_s1, 256 }
  0x71   : > { %p980_p3 = scmp.lt.u32.totalorder %s1277_s30, %s1413_s1  ;;  %p981_p5 = scmp.lt.u32.totalorder %s979_s2, %s974_s7 }
  0x72   : > { %p977_p7 = pnand %p975_p4, %p946_p0  ;;  %p983_p12 = scmp.lt.u32.totalorder %s974_s7, %s1277_s30 }
  0x73   : > { %p982_p9 = por %p981_p5, %p980_p3 }
  0x74   : > { %p978_p1 = pneg %p977_p7 }
  0x75   : > { %p984_p2 = por %p983_p12, %p982_p9 }
  0x77   : > { %p985_p13 = pnand %p984_p2, %p978_p1 }
  0x79   : > { %988 = shalt.err (!%p985_p13)
}
  0x7a   : > { %s989_s10 = scalar_lea.vmem %s268_s20, 128  ;;  %s1091_s16 = smov [#allocation5]  }
  0x7b   : > { %p990_p6 = scmp.ne.s32.totalorder %s268_s20, %s989_s10  ;;  %s994_s17 = sshll.u32 %s1091_s16, 4  ;;  %s995_s17 = int_to_ptr.vmem [resolvable:$false] %s994_s17 }
  0x7c   : > { %s996_s9 = scalar_lea.vmem %s995_s17, 256  ;;  %p997_p7 = scmp.lt.s32.totalorder %s268_s20, %s995_s17 }
  0x7d   : > { %p992_p10 = pnand %p990_p6, %p946_p0  ;;  %p998_p8 = scmp.lt.s32.totalorder %s996_s9, %s989_s10 }
  0x7f   : > { %p993_p4 = pneg %p992_p10  ;;  %p999_p3 = por %p998_p8, %p997_p7 }
  0x81   : > { %p1000_p5 = pnand %p999_p3, %p993_p4 }
  0x83   : > { %1003 = shalt.err (!%p1000_p5)
}
  0x84   : > { %837 = dma.hbm_to_vmem [thread:$0]  (!%p1270_p11), %s1277_s30, 128, %s268_s20, %s257_s15  }
  0x85   : > { %p1435_p1 = scmp.ne.s32.totalorder %s1427_s29, 0 }
  0x86   : > { %s1330_s14 = sand.u32 (!%p1435_p1), 1, %s1074_s22   ;;  %p1436_p8 = scmp.ne.s32.totalorder (!%p1435_p1), %s1425_s27, 0 }
  0x87   : > { %276 = sbr.rel (%p1435_p1) target bundleno = 717 (0x2cd), region = 44  ;;  %s1333_s4 = sshll.u32 (!%p1435_p1), %s1330_s14, 3 }
  0x88   : > { %s279_s7 = scalar_lea.sflag (!%p1435_p1), [#allocation3], %s1330_s14  ;;  %s282_s19 = scalar_lea.vmem (!%p1435_p1), [#allocation2], %s1333_s4 }
  0x8e   : > { %1049 = dma.done.wait (%p1436_p8), %s279_s7, 128  }
  0x8f   : > { %1051 = vsyncadd (%p1436_p8), %s279_s7, 4294967168  ;;  %s287_s29 = sand.u32 1, %s1151_s25   ;;  %s291_s30 = scalar_lea.vmem [#allocation5], %s1333_s4 }
  0x90   : > { %s288_s18 = scalar_lea.sflag [#allocation6], %s287_s29 }
  0x91   : > { %1053 = dma.done.wait (%p1436_p8), %s288_s18, 128  }
  0x92   : > { %1055 = vsyncadd (%p1436_p8), %s288_s18, 4294967168  ;;  %p1437_p11 = scmp.eq.s32.totalorder %s1151_s25, 0 }
  0x94   : > { %1057 = dma.done.wait (%p1437_p11), [#allocation6], 3840   ;;  %p1438_p0 = pmov %p1437_p11 }
  0x96   : > { %1059 = vsyncadd (%p1438_p0), [#allocation6], 4294963456  ;;  %p1439_p9 = pmov %p1438_p0 }
  0x97   : > { %p1440_p12 = pmov %p1438_p0 }
  0x98   : > { %1061 = dma.done.wait (%p1439_p9), [#allocation9], 4096  }
  0x99   : > { %1063 = vsyncadd (%p1440_p12), [#allocation9], 4294963200  ;;  %v1092_v0 = vmov 0.0   ;;  %v334_v1 = vld [vmem:[%s291_s30] sm:$0xff]  ;;  %v342_v2 = vld [vmem:[#allocation7 + $0x8] sm:$0xff]  ;;  %s1093_s20 = smov 60  }
  0x9a   : > { %451 = vmatprep.mubr.f32.mxu0 %v1092_v0  ;;  %v344_v3 = vld [vmem:[#allocation7 + $0x18] sm:$0xff]  ;;  %336 = vrot.lane.b32.xlu0 %v334_v1, %s1093_s20  ;;  %v341_v5 = vld [vmem:[#allocation7] sm:$0xff]  ;;  %v343_v6 = vld [vmem:[#allocation7 + $0x10] sm:$0xff]  ;;  %vm339_vm0 = vcmask 490496   ;;  %vm383_vm1 = vcmask 982016   ;;  %s712_s13 = sshll.u32 %s1151_s25, 7 }
  0x9b   : > { %v750_v4 = vpack.c.bf16 %v344_v3, %v342_v2  ;;  %v346_v7 = vld [vmem:[#allocation7 + $0x28] sm:$0xff]  ;;  %v752_v8 = vpack.c.bf16 %v343_v6, %v341_v5  ;;  %v348_v9 = vld [vmem:[#allocation7 + $0x38] sm:$0xff]  ;;  %v345_v10 = vld [vmem:[#allocation7 + $0x20] sm:$0xff]  ;;  %s332_s11 = scalar_lea.vmem [#allocation10], %s1333_s4  ;;  %s1368_s9 = scalar_lea.hbm %s1418_s6, %s712_s13 }
  0x9c   : > { %v347_v11 = vld [vmem:[#allocation7 + $0x30] sm:$0xff]  ;;  %v754_v12 = vpack.c.bf16 %v348_v9, %v346_v7  ;;  %v350_v13 = vld [vmem:[#allocation7 + $0x48] sm:$0xff]  ;;  %v352_v14 = vld [vmem:[#allocation7 + $0x58] sm:$0xff]  ;;  %s582_s10 = sshll.u32 %s332_s11, 4  ;;  %s569_s7 = scalar_lea.sflag [#allocation4], %s1330_s14  ;;  %s1370_s10 = int_to_ptr.vmem [resolvable:$true] %s582_s10 }
  0x9d   : > { %751 = vmatprep.subr.bf16.mxu0 %v750_v4  ;;  %v756_v15 = vpack.c.bf16 %v347_v11, %v345_v10  ;;  %v758_v16 = vpack.c.bf16 %v352_v14, %v350_v13  ;;  %v349_v17 = vld [vmem:[#allocation7 + $0x40] sm:$0xff]  ;;  %v351_v18 = vld [vmem:[#allocation7 + $0x50] sm:$0xff]  ;;  %v354_v19 = vld [vmem:[#allocation7 + $0x68] sm:$0xff]  ;;  %p1441_p13 = scmp.ne.s32.totalorder %s1433_s12, 0  ;;  %s1094_s25 = smov [#allocation10]  }
  0x9e   : > { %753 = vmatpush1.bf16.msra.mxu0 %v752_v8  ;;  %v356_v20 = vld [vmem:[#allocation7 + $0x78] sm:$0xff]  ;;  %v760_v21 = vpack.c.bf16 %v351_v18, %v349_v17  ;;  %v353_v23 = vld [vmem:[#allocation7 + $0x60] sm:$0xff]  ;;  %v355_v24 = vld [vmem:[#allocation7 + $0x70] sm:$0xff]  ;;  %s1008_s4 = sshll.u32 %s1094_s25, 4  ;;  %s1009_s4 = int_to_ptr.vmem [resolvable:$false] %s1008_s4 }
  0x9f   : > { %755 = vmatprep.subr.bf16.mxu0 %v754_v12  ;;  %v762_v22 = vpack.c.bf16 %v356_v20, %v354_v19  ;;  %v358_v25 = vld [vmem:[#allocation7 + $0x88] sm:$0xff]  ;;  %v360_v26 = vld [vmem:[#allocation7 + $0x98] sm:$0xff]  ;;  %v474_v27 = vld [vmem:[#allocation8 + $0x80] sm:$0xff]  ;;  %v764_v33 = vpack.c.bf16 %v355_v24, %v353_v23  ;;  %s1010_s29 = scalar_lea.vmem %s1009_s4, 256  ;;  %p1011_p4 = scmp.lt.s32.totalorder %s1370_s10, %s1009_s4 }
  0xa0   : > { %v357_v28 = vld [vmem:[#allocation7 + $0x80] sm:$0xff]  ;;  %v359_v29 = vld [vmem:[#allocation7 + $0x90] sm:$0xff]  ;;  %v475_v30 = vld [vmem:[#allocation8 + $0x88] sm:$0xff]  ;;  %v766_v39 = vpack.c.bf16 %v360_v26, %v358_v25 }
  0xa1   : > { %v458_v31 = vld [vmem:[#allocation8] sm:$0xff]  ;;  %v459_v32 = vld [vmem:[#allocation8 + $0x8] sm:$0xff]  ;;  %v778_v34 = vpack.c.bf16 %v475_v30, %v474_v27  ;;  %v476_v36 = vld [vmem:[#allocation8 + $0x90] sm:$0xff]  ;;  %v768_v47 = vpack.c.bf16 %v359_v29, %v357_v28 }
  0xa2   : > { %757 = vmatpush1.bf16.msra.mxu0 %v756_v15  ;;  %v780_v35 = vpack.c.bf16 %v459_v32, %v458_v31  ;;  %v477_v37 = vld [vmem:[#allocation8 + $0x98] sm:$0xff]  ;;  %v460_v38 = vld [vmem:[#allocation8 + $0x10] sm:$0xff]  ;;  %v478_v42 = vld [vmem:[#allocation8 + $0xa0] sm:$0xff] }
  0xa3   : > { %759 = vmatprep.subr.bf16.mxu0 %v758_v16  ;;  %v782_v40 = vpack.c.bf16 %v477_v37, %v476_v36  ;;  %v461_v41 = vld [vmem:[#allocation8 + $0x18] sm:$0xff]  ;;  %v479_v43 = vld [vmem:[#allocation8 + $0xa8] sm:$0xff]  ;;  %779 = vmatprep.subr.bf16.mxu1 %v778_v34  ;;  %v361_v48 = vld [vmem:[#allocation7 + $0xa0] sm:$0xff] }
  0xa4   : > { %v362_v44 = vld [vmem:[#allocation7 + $0xa8] sm:$0xff]  ;;  %v364_v45 = vld [vmem:[#allocation7 + $0xb8] sm:$0xff]  ;;  %781 = vmatpush3.bf16.msra.mxu1 %v780_v35  ;;  %v784_v46 = vpack.c.bf16 %v461_v41, %v460_v38  ;;  %v786_v49 = vpack.c.bf16 %v479_v43, %v478_v42  ;;  %v462_v50 = vld [vmem:[#allocation8 + $0x20] sm:$0xff] }
  0xa5   : > { %783 = vmatprep.subr.bf16.mxu1 %v782_v40  ;;  %v463_v51 = vld [vmem:[#allocation8 + $0x28] sm:$0xff]  ;;  %v770_v52 = vpack.c.bf16 %v364_v45, %v362_v44  ;;  %v363_v53 = vld [vmem:[#allocation7 + $0xb0] sm:$0xff]  ;;  %v480_v54 = vld [vmem:[#allocation8 + $0xb0] sm:$0xff] }
  0xa6   : > { %761 = vmatpush1.bf16.msra.mxu0 %v760_v21  ;;  %v481_v55 = vld [vmem:[#allocation8 + $0xb8] sm:$0xff]  ;;  %v368_v57 = vld [vmem:[#allocation7 + $0xd8] sm:$0xff]  ;;  %v788_v58 = vpack.c.bf16 %v463_v51, %v462_v50  ;;  %v772_v59 = vpack.c.bf16 %v363_v53, %v361_v48  ;;  %v365_v60 = vld [vmem:[#allocation7 + $0xc0] sm:$0xff] }
  0xa7   : > { %763 = vmatprep.subr.bf16.mxu0 %v762_v22  ;;  %v366_v56 = vld [vmem:[#allocation7 + $0xc8] sm:$0xff]  ;;  %v790_v61 = vpack.c.bf16 %v481_v55, %v480_v54  ;;  %v464_v62 = vld [vmem:[#allocation8 + $0x30] sm:$0xff]  ;;  %v367_v1 = vld [vmem:[#allocation7 + $0xd0] sm:$0xff] }
  0xa8   : > { %785 = vmatpush3.bf16.msra.mxu1 %v784_v46  ;;  %v465_v63 = vld [vmem:[#allocation8 + $0x38] sm:$0xff]  ;;  %v774_v0 = vpack.c.bf16 %v368_v57, %v366_v56  ;;  %v482_v2 = vld [vmem:[#allocation8 + $0xc0] sm:$0xff]  ;;  %v483_v3 = vld [vmem:[#allocation8 + $0xc8] sm:$0xff]  ;;  %v776_v5 = vpack.c.bf16 %v367_v1, %v365_v60 }
  0xa9   : > { %787 = vmatprep.subr.bf16.mxu1 %v786_v49  ;;  %v792_v4 = vpack.c.bf16 %v465_v63, %v464_v62  ;;  %v794_v6 = vpack.c.bf16 %v483_v3, %v482_v2  ;;  %v466_v7 = vld [vmem:[#allocation8 + $0x40] sm:$0xff]  ;;  %v467_v8 = vld [vmem:[#allocation8 + $0x48] sm:$0xff]  ;;  %v484_v9 = vld [vmem:[#allocation8 + $0xd0] sm:$0xff] }
  0xaa   : > { %765 = vmatpush1.bf16.msra.mxu0 %v764_v33  ;;  %v485_v10 = vld [vmem:[#allocation8 + $0xd8] sm:$0xff]  ;;  %v796_v12 = vpack.c.bf16 %v467_v8, %v466_v7  ;;  %v468_v14 = vld [vmem:[#allocation8 + $0x50] sm:$0xff]  ;;  %v486_v17 = vld [vmem:[#allocation8 + $0xe0] sm:$0xff]  ;;  %v373_v33 = vlaneseq }
  0xab   : > { %767 = vmatprep.subr.bf16.mxu0 %v766_v39  ;;  %v370_v11 = vld [vmem:[#allocation7 + $0xe8] sm:$0xff]  ;;  %v798_v13 = vpack.c.bf16 %v485_v10, %v484_v9  ;;  %v369_v16 = vld [vmem:[#allocation7 + $0xe0] sm:$0xff]  ;;  %v487_v18 = vld [vmem:[#allocation8 + $0xe8] sm:$0xff] }
  0xac   : > { %789 = vmatpush3.bf16.msra.mxu1 %v788_v58  ;;  %v469_v15 = vld [vmem:[#allocation8 + $0x58] sm:$0xff]  ;;  %v802_v20 = vpack.c.bf16 %v487_v18, %v486_v17  ;;  %v470_v21 = vld [vmem:[#allocation8 + $0x60] sm:$0xff]  ;;  %v471_v22 = vld [vmem:[#allocation8 + $0x68] sm:$0xff]  ;;  %v374_v34 = vshrl.u32 %v373_v33, 7 }
  0xad   : > { %791 = vmatprep.subr.bf16.mxu1 %v790_v61  ;;  %v800_v19 = vpack.c.bf16 %v469_v15, %v468_v14  ;;  %v804_v23 = vpack.c.bf16 %v471_v22, %v470_v21  ;;  %v333_v24 = vld [vmem:[%s282_s19] sm:$0xff]  ;;  %s1004_s19 = scalar_lea.vmem %s1370_s10, 128 }
  0xae   : > { %769 = vmatpush1.bf16.msra.mxu0 %v768_v47  ;;  %v488_v27 = vld [vmem:[#allocation8 + $0xf0] sm:$0xff]  ;;  %v489_v28 = vld [vmem:[#allocation8 + $0xf8] sm:$0xff]  ;;  %v379_v35 = vsub.s32 1, %v374_v34  ;;  %v375_v37 = vsub.s32 0, %v374_v34  ;;  %p1005_p2 = scmp.ne.s32.totalorder %s1370_s10, %s1004_s19  ;;  %p1012_p7 = scmp.lt.s32.totalorder %s1010_s29, %s1004_s19 }
  0xaf   : > { %771 = vmatprep.subr.bf16.mxu0 %v770_v52  ;;  %v806_v29 = vpack.c.bf16 %v489_v28, %v488_v27  ;;  %v472_v30 = vld [vmem:[#allocation8 + $0x70] sm:$0xff]  ;;  %v473_v31 = vld [vmem:[#allocation8 + $0x78] sm:$0xff] }
  0xb0   : > { %793 = vmatpush3.bf16.msra.mxu1 %v792_v4  ;;  %v808_v32 = vpack.c.bf16 %v473_v31, %v472_v30  ;;  %v371_v36 = vld [vmem:[%s1415_s3] sm:$0x3]  ;;  %p1006_p6 = pnand %p1005_p2, %p1441_p13  ;;  %p1013_p3 = por %p1012_p7, %p1011_p4 }
  0xb1   : > { %795 = vmatprep.subr.bf16.mxu1 %v794_v6  ;;  %v380_v38 = vrot.slane %v371_v36, %v379_v35  ;;  %v376_v39 = vrot.slane %v371_v36, %v375_v37  ;;  %v710_v45 = vld [vmem:[%s1417_s5] ss:$0 sm:$0xff] }
  0xb2   : > { %773 = vmatpush1.bf16.msra.mxu0 %v772_v59  ;;  %p1007_p10 = pneg %p1006_p6 }
  0xb3   : > { %775 = vmatprep.subr.bf16.mxu0 %v774_v0 }
  0xb4   : > { %797 = vmatpush3.bf16.msra.mxu1 %v796_v12  ;;  %p1014_p5 = pnand %p1013_p3, %p1007_p10 }
  0xb5   : > { %799 = vmatprep.subr.bf16.mxu1 %v798_v13 }
  0xb6   : > { %777 = vmatpush1.bf16.msra.mxu0 %v776_v5 }
  0xb7   : > { %415 = vmatprep.subr.mxu0 %v370_v11 }
  0xb8   : > { %801 = vmatpush3.bf16.msra.mxu1 %v800_v19 }
  0xb9   : > { %803 = vmatprep.subr.bf16.mxu1 %v802_v20 }
  0xba   : > { %416 = vmatpush1.msra.mxu0 %v369_v16 }
  0xbc   : > { %805 = vmatpush3.bf16.msra.mxu1 %v804_v23 }
  0xbd   : > { %807 = vmatprep.subr.bf16.mxu1 %v806_v29 }
  0xc0   : > { %809 = vmatpush3.bf16.msra.mxu1 %v808_v32 }
 0x10c   : > { %v337_v25 = vpop.permute.xlu0 %336 }
 0x10d   : > { %v340_v26 = vsel %vm339_vm0, %v333_v24, %v337_v25 }
 0x10e   : > { %709 = vmatmul.mubr.msk.f32.vlgmr.msra.gmra.mrb[0].mxu0 %vm383_vm1, %v340_v26 }
 0x1e1   : > { %v453_v40 = vpop.f32.mrb[0].mxu0 }
 0x1e2   : > { %v455_v41 = vpop.f32.mrb[1].mxu0  ;;  %v454_v43 = vadd.f32 %v453_v40, %v376_v39 }
 0x1e3   : > { %v456_v42 = vadd.f32 %v455_v41, %v380_v38 }
 0x1e5   : > { %561 = vmatprep.mubr.f32.mxu1 %v456_v42 }
 0x1e6   : > { %562 = vmatmul.mubr.f32.vlgmr.msra.gmra.mrb[0].mxu1 %v454_v43 }
 0x2b9   : > { %v747_v44 = vpop.f32.mrb[0].mxu1 }
 0x2ba   : > { %v748_v46 = vpop.f32.mrb[1].mxu1 }
 0x2bb   : > { %v749_v47 = vadd.f32 %v748_v46, %v747_v44 }
 0x2bd   : > { %v564_v48 = vadd.f32 %v749_v47, %v710_v45 }
 0x2bf   : > { %567 = vst [vmem:[%s332_s11] sm:$0xff] %v564_v48 }
 0x2c0   : > { %1017 = shalt.err (!%p1014_p5)
}
 0x2c1   : > { %s1018_s14 = scalar_lea.hbm %s1368_s9, 128  ;;  %s1022_s20 = scalar_lea.hbm %s1418_s6, 256 }
 0x2c2   : > { %p1019_p1 = scmp.ne.s32.totalorder %s1368_s9, %s1018_s14  ;;  %p1023_p0 = scmp.lt.u32.totalorder %s1368_s9, %s1418_s6 }
 0x2c3   : > { %p1024_p9 = scmp.lt.u32.totalorder %s1022_s20, %s1018_s14  ;;  %p1026_p2 = scmp.lt.u32.totalorder %s1018_s14, %s1368_s9 }
 0x2c4   : > { %p1020_p8 = pnand %p1019_p1, %p1441_p13 }
 0x2c5   : > { %p1025_p12 = por %p1024_p9, %p1023_p0 }
 0x2c6   : > { %p1021_p11 = pneg %p1020_p8 }
 0x2c7   : > { %p1027_p6 = por %p1026_p2, %p1025_p12 }
 0x2c9   : > { %p1028_p10 = pnand %p1027_p6, %p1021_p11 }
 0x2cb   : > { %1031 = shalt.err (!%p1028_p10)
}
 0x2cc   : > { %822 = dma.vmem_to_hbm [thread:$0]  (%p1441_p13), %s1370_s10, 128, %s1368_s9, %s569_s7  }
 0x2cd PF: > { %s594_s8 = sand.u32 1, %s1070_s21   ;;  %p1442_p4 = scmp.ne.s32.totalorder %s1426_s28, 0 }
 0x2ce   : > { %p1443_p7 = scmp.ge.s32.totalorder %s1082_s24, 2  ;;  %s595_s2 = scalar_lea.sflag [#allocation4], %s594_s8 }
 0x2d0   : > { %p839_p3 = pnand %p1443_p7, %p1442_p4 }
 0x2d2   : > { %1065 = dma.done.wait (!%p839_p3), %s595_s2, 128  }
 0x2d3   : > { %1067 = vsyncadd (!%p839_p3), %s595_s2, 4294967168  ;;  %s1444_s13 = sld [smem:[#allocation16_spill]]  ;;  %p23_p5 = scmp.ge.s32.totalorder %s1240_s26, 4  }
 0x2d4   : > { %s1445_s21 = smov %s1074_s22  ;;  %s1446_s22 = smov %s1078_s23 }
 0x2d5   : > { %s1448_s24 = smov %s1240_s26  ;;  %25 = sbr.rel (!%p23_p5) target bundleno = 11 (0xb), region = 110 }
 0x2d9   : > { %s1447_s23 = smov %s1444_s13 }
 0x2dc   :  { %600 = vsyncpa [#allocation3], 1 }
 0x2dd   :  { %602 = vsyncpa [#allocation3 + $0x1], 1 }
 0x2de   :  { %603 = vsyncpa [#allocation6], 1 }
 0x2df   :  { %605 = vsyncpa [#allocation6 + $0x1], 1 }
 0x2e0   :  { %606 = vsyncpa [#allocation9], 1 }
 0x2e1   :  { %607 = vsyncpa [#allocation4], 1 }
 0x2e2   :  { %609 = vsyncpa [#allocation4 + $0x1], 1 }

</bundles_post_ra>
